<compile_context>
chip_gen: v6e
topology: v6e:2x2x1
jax: 0.10.0
libtpu: 0.0.40
codegen_flags: <defaults>
</compile_context>

<pallas_src>
import jax
import jax.numpy as jnp
from jax.experimental import pallas as pl
from jax.experimental.pallas import tpu as pltpu


def _copy_kernel(x_ref, o_ref):
    # Pure pass-through of the current (block_r, lane) tile.
    o_ref[...] = x_ref[...]


# ~2 MiB per tile -> 4 double-buffered tiles (in + out) ~= 8 MiB of VMEM,
# comfortably under the scoped default on v5e (16 MiB), v6e (32 MiB) and
# v7x (32 MiB of its 64 MiB physical VMEM), while large enough to reach
# ~85% of HBM roofline for a streaming copy.
_TARGET_TILE_BYTES = 2 * 1024 * 1024


def _pallas_identity_copy(x, *, donate=False):
    """Explicit HBM->HBM copy of `x` through a Pallas kernel."""
    orig_shape = x.shape
    total = int(x.size)
    itemsize = jnp.dtype(x.dtype).itemsize

    # Lane-dense flattening: make the last dim a multiple of 128 whenever the
    # element count allows, so stores are full-vreg (unmasked) vst.
    lane = None
    for cand in (1024, 512, 256, 128):
        if total % cand == 0:
            lane = cand
            break
    if lane is None:
        # Fall back to the original trailing dim; a block whose last dim
        # equals the full extent is always a legal Mosaic block shape.
        lane = orig_shape[-1] if x.ndim > 0 else 1
    rows = total // lane
    x2 = x.reshape(rows, lane)

    # Bytes-based row-tile selection (not a divisor heuristic).  block_r is
    # either a multiple of 8 or the full `rows` extent, so the block shape is
    # always legal; a non-divisible final block is handled by Pallas masking.
    row_bytes = lane * itemsize
    if rows <= 8:
        block_r = rows
    else:
        block_r = min(rows, max(8, _TARGET_TILE_BYTES // row_bytes))
        block_r = (block_r // 8) * 8
        if block_r >= rows:
            block_r = rows

    grid = pl.cdiv(rows, block_r)

    out2 = pl.pallas_call(
        _copy_kernel,
        out_shape=jax.ShapeDtypeStruct((rows, lane), x.dtype),
        grid_spec=pltpu.PrefetchScalarGridSpec(
            num_scalar_prefetch=0,
            grid=(grid,),
            in_specs=[pl.BlockSpec((block_r, lane), lambda i: (i, 0))],
            out_specs=pl.BlockSpec((block_r, lane), lambda i: (i, 0)),
        ),
        compiler_params=pltpu.CompilerParams(
            dimension_semantics=("parallel",),
        ),
        # Alias input->output only when the caller can donate x (avoids a
        # second full-size HBM allocation for large feature maps).
        input_output_aliases=({0: 0} if donate else {}),
    )(x2)
    return out2.reshape(orig_shape)


def sam2_forward(x, *, materialize=False, donate=False):
    """Pallas implementation of SAM2.forward (identity).

    Default (fast) path: return x directly — an XLA-level identity with zero
    HBM traffic, which strictly dominates any tuned copy kernel.
    materialize=True forces an explicit Pallas copy into a fresh buffer.
    """
    if not materialize:
        return x
    return _pallas_identity_copy(x, donate=donate)


if __name__ == "__main__":
    key = jax.random.PRNGKey(0)
    # Small shapes consistent with an image-model forward: batch=2,
    # channels=4, spatial=16x16.
    x = jax.random.normal(key, (2, 4, 16, 16), dtype=jnp.float32)

    # SAM2 has no parameters (empty __init__ / init_weights): nothing to init.

    # Fast path (the real SAM2.forward semantics): no kernel, no HBM traffic.
    y_fast = jax.block_until_ready(sam2_forward(x))
    assert y_fast.shape == x.shape and y_fast.dtype == x.dtype
    assert bool(jnp.array_equal(y_fast, x))

    # Pallas copy path: exercised once to verify the kernel compiles and runs.
    y_copy = jax.block_until_ready(sam2_forward(x, materialize=True))
    assert y_copy.shape == x.shape and y_copy.dtype == x.dtype
    assert bool(jnp.array_equal(y_copy, x))

    print("KERNEL_OK")
</pallas_src>

<mosaic_0001>
module attributes {stable_mosaic.version = 11 : i64} {
  func.func @_copy_kernel(%arg0: i32, %arg1: memref<2x1024xf32, #tpu.memory_space<vmem>>, %arg2: memref<2x1024xf32, #tpu.memory_space<vmem>>) attributes {dimension_semantics = [#tpu.dimension_semantics<parallel>], iteration_bounds = array<i64: 1>, scalar_prefetch = 0 : i64, scratch_operands = 0 : i64, tpu.core_type = #tpu.core_type<tc>, window_params = [{transform_indices = @transform_0, window_bounds = array<i64: 2, 1024>}, {transform_indices = @transform_1, window_bounds = array<i64: 2, 1024>}]} {
    %c0 = arith.constant 0 : index
    %c0_0 = arith.constant 0 : index
    %0 = vector.load %arg1[%c0, %c0_0] : memref<2x1024xf32, #tpu.memory_space<vmem>>, vector<2x1024xf32>
    %c0_1 = arith.constant 0 : index
    %c0_2 = arith.constant 0 : index
    %1 = vector.load %arg2[%c0_1, %c0_2] : memref<2x1024xf32, #tpu.memory_space<vmem>>, vector<2x1024xf32>
    tpu.vector_store %arg2[%c0_1, %c0_2], %0 {strides = array<i32>} : memref<2x1024xf32, #tpu.memory_space<vmem>>, vector<2x1024xf32>,
    return
  }
  func.func @transform_0(%arg0: i32) -> (i32, i32) {
    %c0_i32 = arith.constant 0 : i32
    %c0_i32_0 = arith.constant 0 : i32
    return %arg0, %c0_i32 : i32, i32
  }
  func.func @transform_1(%arg0: i32) -> (i32, i32) {
    %c0_i32 = arith.constant 0 : i32
    %c0_i32_0 = arith.constant 0 : i32
    return %arg0, %c0_i32 : i32, i32
  }
}

</mosaic_0001>

<bundles_post_ra>
// kernel: tpu_custom_call.1
= control target key start
LH: loop header
LB: loop body
LE: loop exit
PB: predicated region body
PF: predicated region fallthrough
CT: control target
= control target key end

     0   :  { %6 = vsyncpa [#allocation3], 0  ;;  %s104_s0 = inlined_call_operand.hbm [shape: f32[2,1024], index: 0, kind: input, shape index: {}]   ;;  %s105_s1 = inlined_call_operand.hbm [shape: f32[2,1024], index: 1, kind: output, shape index: {}]  }
   0x1   :  { %7 = vsyncpa [#allocation4], 0  ;;  %s86_s6 = smov [#allocation2]  }
   0x2   :  { %s14_s7 = sshll.u32 %s86_s6, 4  ;;  %s15_s7 = int_to_ptr.vmem [resolvable:$true] %s14_s7 }
   0x3   :  { %s50_s8 = scalar_lea.vmem %s15_s7, 256  ;;  %p55_p1 = scmp.lt.s32.totalorder %s15_s7, %s15_s7 }
   0x4   :  { %p51_p0 = scmp.ne.s32.totalorder %s15_s7, %s50_s8  ;;  %p56_p2 = scmp.lt.s32.totalorder %s50_s8, %s50_s8 }
   0x6   :  { %p57_p3 = por %p56_p2, %p55_p1 }
   0x8   :  { %p58_p4 = pnand %p57_p3, %p51_p0 }
   0xa   :  { %61 = shalt.err (!%p58_p4)
}
   0xb   :  { %17 = dma.hbm_to_vmem [thread:$0]  %s104_s0, 256, %s15_s7, [#allocation3]  }
   0xc   :  { %82 = dma.done.wait [#allocation3], 256  }
   0xd   :  { %83 = vsyncadd [#allocation3], 4294967040  ;;  %s87_s11 = smov [#allocation5]   ;;  %v21_v0 = vld [vmem:[#allocation2] sm:$0xff]  ;;  %v22_v1 = vld [vmem:[#allocation2 + $0x8] sm:$0xff] }
   0xe   :  { %s31_s12 = sshll.u32 %s87_s11, 4  ;;  %23 = vst [vmem:[#allocation5] sm:$0xff] %v21_v0  ;;  %24 = vst [vmem:[#allocation5 + $0x8] sm:$0xff] %v22_v1  ;;  %s32_s12 = int_to_ptr.vmem [resolvable:$true] %s31_s12 }
   0xf   :  { %s62_s13 = scalar_lea.vmem %s32_s12, 256  ;;  %p67_p6 = scmp.lt.s32.totalorder %s32_s12, %s32_s12 }
  0x10   :  { %p63_p5 = scmp.ne.s32.totalorder %s32_s12, %s62_s13  ;;  %p68_p7 = scmp.lt.s32.totalorder %s62_s13, %s62_s13 }
  0x12   :  { %p69_p8 = por %p68_p7, %p67_p6 }
  0x14   :  { %p70_p9 = pnand %p69_p8, %p63_p5 }
  0x16   :  { %73 = shalt.err (!%p70_p9)
}
  0x17   :  { %34 = dma.vmem_to_hbm [thread:$0]  %s32_s12, 256, %s105_s1, [#allocation4]  }
  0x18   :  { %84 = dma.done.wait [#allocation4], 256  }
  0x19   :  { %85 = vsyncadd [#allocation4], 4294967040 }
  0x1a   :  { %38 = vsyncpa [#allocation3], 1 }
  0x1b   :  { %39 = vsyncpa [#allocation4], 1 }

</bundles_post_ra>
